<compile_context>
chip_gen: v6e
topology: v6e:2x2x1
jax: 0.10.0
libtpu: 0.0.40
codegen_flags: <defaults>
</compile_context>

<pallas_src>
import functools
import math
from typing import NamedTuple

import jax
import jax.numpy as jnp
from jax.experimental import pallas as pl
from jax.experimental.pallas import tpu as pltpu


def _round_up(x: int, m: int) -> int:
    return (x + m - 1) // m * m


class PFFParams(NamedTuple):
    """Pre-padded, pre-cast PFF parameters (built once, reused every call)."""
    w1: jax.Array      # (D_p, H_p) weight_dtype
    b1: jax.Array      # (1, H_p)   f32
    w2: jax.Array      # (H_p, D_p) weight_dtype
    b2: jax.Array      # (1, D_p)   f32
    gamma: jax.Array   # (1, D_p)   f32
    beta: jax.Array    # (1, D_p)   f32
    d: int             # true model dim
    h: int             # true hidden dim


def prepare_pff_params(w1, b1, w2, b2, gamma, beta, *, weight_dtype=jnp.bfloat16):
    """Pad to lane-friendly shapes and cast weights to the MXU dtype ONCE."""
    D, H = w1.shape
    # D is only padded when it is > 128 and not a multiple of 128 (full-dim
    # blocks are legal for small / exact D and avoid inflating x/out traffic).
    D_p = D if (D % 128 == 0 or D <= 128) else _round_up(D, 128)
    H_p = _round_up(H, 128)       # weight-only padding: free (done once here)
    f32 = jnp.float32
    w1_p = jnp.pad(w1.astype(f32), ((0, D_p - D), (0, H_p - H))).astype(weight_dtype)
    w2_p = jnp.pad(w2.astype(f32), ((0, H_p - H), (0, D_p - D))).astype(weight_dtype)
    b1_p = jnp.pad(b1.astype(f32), (0, H_p - H)).reshape(1, H_p)
    b2_p = jnp.pad(b2.astype(f32), (0, D_p - D)).reshape(1, D_p)
    g_p = jnp.pad(gamma.astype(f32), (0, D_p - D)).reshape(1, D_p)
    be_p = jnp.pad(beta.astype(f32), (0, D_p - D)).reshape(1, D_p)
    return PFFParams(w1_p, b1_p, w2_p, b2_p, g_p, be_p, int(D), int(H))


# ---------------------------------------------------------------------------
# Kernel
# ---------------------------------------------------------------------------
def pff_kernel(x_ref, w1_ref, b1_ref, w2_ref, b2_ref, gamma_ref, beta_ref,
               o_ref, acc_ref, *, inv_d: float, pad_cols: float):
    k = pl.program_id(1)

    @pl.when(k == 0)
    def _():
        acc_ref[...] = jnp.zeros_like(acc_ref)

    # x stays f32 for the residual / LayerNorm; MXU operands are cast to the
    # weight dtype (bf16) with f32 accumulation.
    x = x_ref[...].astype(jnp.float32)                               # (tm, D_p)

    # linear1 chunk + ReLU.  Hidden activation is kept in bf16 (only one
    # (tm, tk_h) low-precision buffer stays live into the second matmul).
    h = jnp.dot(x.astype(w1_ref.dtype), w1_ref[...],
                preferred_element_type=jnp.float32) + b1_ref[...]
    h = jnp.maximum(h, 0.0).astype(w2_ref.dtype)                     # (tm, tk_h)

    # dropout(p=0.2) -> identity (eval mode)

    # linear2 chunk, accumulated in f32 VMEM scratch across hidden chunks.
    acc_ref[...] += jnp.dot(h, w2_ref[...], preferred_element_type=jnp.float32)

    @pl.when(k == pl.num_programs(1) - 1)
    def _():
        # bias2 + residual (f32).  Padded lanes of acc / b2 / x are exactly 0.
        y = acc_ref[...] + b2_ref[...] + x                           # (tm, D_p)

        # LayerNorm over the *true* model dim D (two-pass centered variance).
        # Padded lanes of y are 0, so (y - mean) there is exactly -mean; the
        # closed-form correction pad_cols * mean^2 removes their contribution.
        mean = jnp.sum(y, axis=-1, keepdims=True) * inv_d
        c = y - mean
        var = (jnp.sum(c * c, axis=-1, keepdims=True)
               - pad_cols * mean * mean) * inv_d
        y_hat = c * jax.lax.rsqrt(var + 1e-5)
        # padded gamma/beta lanes are 0 -> padded output lanes stay 0
        o_ref[...] = (y_hat * gamma_ref[...] + beta_ref[...]).astype(o_ref.dtype)


# ---------------------------------------------------------------------------
# Tiling / VMEM budgeting
# ---------------------------------------------------------------------------
def _vmem_estimate(tm, d_p, h_p, tk_h, resident, x_bytes, out_bytes, w_bytes):
    est = 0
    if resident:
        est += 2 * d_p * h_p * w_bytes          # W1 + W2, single buffer
        est += h_p * 4                          # b1 (resident)
    else:
        est += 2 * 2 * d_p * tk_h * w_bytes     # W1 + W2 chunks, double-buffered
        est += 2 * tk_h * 4                     # b1 chunk, double-buffered
    est += 3 * d_p * 4                          # b2 / gamma / beta (resident)
    est += 2 * tm * d_p * x_bytes               # x tile (double-buffered)
    est += 2 * tm * d_p * out_bytes             # out tile (double-buffered)
    est += tm * d_p * 4                         # f32 accumulator scratch
    est += tm * d_p * (4 + w_bytes)             # in-kernel f32 x + bf16 x temps
    est += tm * tk_h * (4 + w_bytes)            # pre-ReLU f32 + bf16 hidden
    est += 2 * tm * d_p * 4                     # epilogue y / y_hat temps
    return int(est)


def _choose_tiling(N, D_p, H_p, x_bytes, out_bytes, w_bytes, budget,
                   tm=None, tk_h=None, prefer_tm=256):
    tm_cap = max(8, _round_up(min(N, prefer_tm if tm is None else tm), 8))
    tm_cands = sorted({c for c in (tm_cap, 512, 256, 128, 64, 32, 16, 8)
                       if c <= tm_cap}, reverse=True)

    if tk_h is not None:
        if not (tk_h == H_p or (tk_h % 128 == 0 and H_p % tk_h == 0)):
            raise ValueError(f"tk_h={tk_h} must equal H_p={H_p} or be a "
                             f"multiple of 128 that divides H_p")
        tk_cands = [tk_h]
    else:
        tk_cands = [H_p] + [c for c in (1024, 768, 512, 384, 256, 128)
                            if c < H_p and H_p % c == 0]

    # Pass 1: prefer fully-resident weights (one HBM fetch total), but don't
    # shrink the row tile below 128 just to stay resident.
    tm_floor = min(128, tm_cap)
    if tk_cands[0] == H_p:
        for tm_c in tm_cands:
            if tm_c < tm_floor:
                break
            if _vmem_estimate(tm_c, D_p, H_p, H_p, True,
                              x_bytes, out_bytes, w_bytes) <= budget:
                return tm_c, H_p, True

    # Pass 2: stream the hidden axis (chunked, double-buffered weights).
    for tm_c in tm_cands:
        for tk_c in tk_cands:
            resident = (tk_c == H_p)
            if _vmem_estimate(tm_c, D_p, H_p, tk_c, resident,
                              x_bytes, out_bytes, w_bytes) <= budget:
                return tm_c, tk_c, resident

    # Fallback: smallest configuration (vmem_limit is raised accordingly).
    return tm_cands[-1], tk_cands[-1], tk_cands[-1] == H_p


# ---------------------------------------------------------------------------
# Forward wrapper
# ---------------------------------------------------------------------------
def pff_forward(x, params: PFFParams, *, tm=None, tk_h=None, out_dtype=None):
    """x: [..., D]; params: from prepare_pff_params. Returns [..., D]."""
    D, H = params.d, params.h
    if x.shape[-1] != D:
        raise ValueError(f"x last dim {x.shape[-1]} != model dim {D}")
    D_p, H_p = params.w1.shape
    out_dtype = x.dtype if out_dtype is None else out_dtype

    N = int(math.prod(x.shape[:-1]))
    x_bytes = jnp.dtype(x.dtype).itemsize
    out_bytes = jnp.dtype(out_dtype).itemsize
    w_bytes = jnp.dtype(params.w1.dtype).itemsize

    try:
        phys_vmem = int(pltpu.get_tpu_info().vmem_capacity_bytes)
    except Exception:
        phys_vmem = 64 << 20                      # conservative (v7x per-TC)
    budget = int(0.70 * phys_vmem)                # leave pipelining headroom
    prefer_tm = 512 if phys_vmem >= (96 << 20) else 256

    tm, tk_h, resident = _choose_tiling(
        N, D_p, H_p, x_bytes, out_bytes, w_bytes, budget,
        tm=tm, tk_h=tk_h, prefer_tm=prefer_tm)

    N_p = _round_up(N, tm)
    n_row = N_p // tm
    n_h = H_p // tk_h

    # Only materialize a padded activation copy when actually required.
    x2d = x.reshape(N, D)
    if N_p != N or D_p != D:
        x_in = jnp.pad(x2d, ((0, N_p - N), (0, D_p - D)))
    else:
        x_in = x2d

    est = _vmem_estimate(tm, D_p, H_p, tk_h, resident, x_bytes, out_bytes, w_bytes)
    vmem_limit = int(min(0.9 * phys_vmem, max(1.3 * est, 32 << 20)))

    one_buf = pl.Buffered(buffer_count=1)   # grid-invariant: no double buffer
    w_kw = dict(pipeline_mode=one_buf) if resident else {}

    kernel = functools.partial(pff_kernel, inv_d=1.0 / D,
                               pad_cols=float(D_p - D))

    out = pl.pallas_call(
        kernel,
        out_shape=jax.ShapeDtypeStruct((N_p, D_p), out_dtype),
        grid_spec=pltpu.PrefetchScalarGridSpec(
            num_scalar_prefetch=0,
            grid=(n_row, n_h),
            in_specs=[
                pl.BlockSpec((tm, D_p), lambda i, k: (i, 0)),                    # x rows
                pl.BlockSpec((D_p, tk_h), lambda i, k: (0, k), **w_kw),          # W1 chunk
                pl.BlockSpec((1, tk_h), lambda i, k: (0, k), **w_kw),            # b1 chunk
                pl.BlockSpec((tk_h, D_p), lambda i, k: (k, 0), **w_kw),          # W2 chunk
                pl.BlockSpec((1, D_p), lambda i, k: (0, 0), pipeline_mode=one_buf),  # b2
                pl.BlockSpec((1, D_p), lambda i, k: (0, 0), pipeline_mode=one_buf),  # gamma
                pl.BlockSpec((1, D_p), lambda i, k: (0, 0), pipeline_mode=one_buf),  # beta
            ],
            out_specs=pl.BlockSpec((tm, D_p), lambda i, k: (i, 0)),
            scratch_shapes=[pltpu.VMEM((tm, D_p), jnp.float32)],
        ),
        compiler_params=pltpu.CompilerParams(
            dimension_semantics=("parallel", "arbitrary"),
            vmem_limit_bytes=vmem_limit,
        ),
    )(x_in, params.w1, params.b1, params.w2, params.b2, params.gamma, params.beta)

    if N_p != N or D_p != D:
        out = out[:N, :D]
    return out.reshape(*x.shape[:-1], D)


# ---------------------------------------------------------------------------
# Init + references
# ---------------------------------------------------------------------------
def init_params(key, model_dimension, width_mult=4):
    """Deterministic init mimicking nn.Linear default (uniform +/- 1/sqrt(fan_in))."""
    D = model_dimension
    H = width_mult * D
    k1, k2, k3, k4 = jax.random.split(key, 4)
    bound1 = 1.0 / jnp.sqrt(D)
    bound2 = 1.0 / jnp.sqrt(H)
    w1 = jax.random.uniform(k1, (D, H), jnp.float32, -bound1, bound1)  # (in, out)
    b1 = jax.random.uniform(k2, (H,), jnp.float32, -bound1, bound1)
    w2 = jax.random.uniform(k3, (H, D), jnp.float32, -bound2, bound2)
    b2 = jax.random.uniform(k4, (D,), jnp.float32, -bound2, bound2)
    gamma = jnp.ones((D,), jnp.float32)
    beta = jnp.zeros((D,), jnp.float32)
    return w1, b1, w2, b2, gamma, beta


def pff_reference_f32(x, w1, b1, w2, b2, gamma, beta):
    h = jnp.maximum(x @ w1 + b1, 0.0)
    y = h @ w2 + b2 + x
    mean = jnp.mean(y, axis=-1, keepdims=True)
    var = jnp.mean((y - mean) ** 2, axis=-1, keepdims=True)
    return (y - mean) * jax.lax.rsqrt(var + 1e-5) * gamma + beta


def pff_reference_mixed(x, w1, b1, w2, b2, gamma, beta, weight_dtype=jnp.bfloat16):
    """Mirrors the kernel numerics: bf16 MXU operands, f32 accumulation / LN."""
    h = jnp.dot(x.astype(weight_dtype), w1.astype(weight_dtype),
                preferred_element_type=jnp.float32) + b1
    h = jnp.maximum(h, 0.0)
    y = jnp.dot(h.astype(weight_dtype), w2.astype(weight_dtype),
                preferred_element_type=jnp.float32) + b2 + x
    mean = jnp.mean(y, axis=-1, keepdims=True)
    var = jnp.mean((y - mean) ** 2, axis=-1, keepdims=True)
    return (y - mean) * jax.lax.rsqrt(var + 1e-5) * gamma + beta


if __name__ == "__main__":
    key = jax.random.PRNGKey(0)

    # Case 1: module-implied small shape (model_dimension=32 -> hidden=128).
    B, S, D = 2, 8, 32
    kx, kp, key = jax.random.split(key, 3)
    x = jax.random.normal(kx, (B, S, D), jnp.float32)
    raw = init_params(kp, D, width_mult=4)
    params = prepare_pff_params(*raw)          # pad + bf16-cast once (hoisted)
    out = jax.block_until_ready(pff_forward(x, params))
    assert out.shape == (B, S, D)
    assert jnp.allclose(out, pff_reference_mixed(x, *raw), atol=1e-3, rtol=1e-3)
    assert jnp.allclose(out, pff_reference_f32(x, *raw), atol=3e-2, rtol=3e-2)

    # Case 2: ragged shapes -> row padding, non-128 D (full-dim blocks), multi-row grid.
    B2, S2, D2 = 3, 45, 96
    kx2, kp2, key = jax.random.split(key, 3)
    x2 = jax.random.normal(kx2, (B2, S2, D2), jnp.float32)
    raw2 = init_params(kp2, D2, width_mult=4)
    params2 = prepare_pff_params(*raw2)
    out2 = jax.block_until_ready(pff_forward(x2, params2, tm=64))
    assert out2.shape == (B2, S2, D2)
    assert jnp.allclose(out2, pff_reference_mixed(x2, *raw2), atol=1e-3, rtol=1e-3)

    # Case 3: force the hidden-axis streaming path (H_p=384 -> 3 chunks of 128).
    out3 = jax.block_until_ready(pff_forward(x2, params2, tm=64, tk_h=128))
    assert out3.shape == (B2, S2, D2)
    assert jnp.allclose(out3, out2, atol=1e-4, rtol=1e-4)

    # Case 4: bf16 I/O (x in bf16, bf16 output).
    xb = x.astype(jnp.bfloat16)
    outb = jax.block_until_ready(pff_forward(xb, params, out_dtype=jnp.bfloat16))
    assert outb.dtype == jnp.bfloat16
    ref_b = pff_reference_mixed(xb.astype(jnp.float32), *raw)
    assert jnp.allclose(outb.astype(jnp.float32), ref_b, atol=3e-2, rtol=3e-2)

    print("KERNEL_OK")
</pallas_src>

<mosaic_0001>
module attributes {stable_mosaic.version = 11 : i64} {
  func.func @pff_kernel(%arg0: i32, %arg1: i32, %arg2: memref<16x32xf32, #tpu.memory_space<vmem>>, %arg3: memref<32x128xbf16, #tpu.memory_space<vmem>>, %arg4: memref<1x128xf32, #tpu.memory_space<vmem>>, %arg5: memref<128x32xbf16, #tpu.memory_space<vmem>>, %arg6: memref<1x32xf32, #tpu.memory_space<vmem>>, %arg7: memref<1x32xf32, #tpu.memory_space<vmem>>, %arg8: memref<1x32xf32, #tpu.memory_space<vmem>>, %arg9: memref<16x32xf32, #tpu.memory_space<vmem>>, %arg10: memref<16x32xf32, #tpu.memory_space<vmem>>) attributes {dimension_semantics = [#tpu.dimension_semantics<parallel>, #tpu.dimension_semantics<arbitrary>], iteration_bounds = array<i64: 1, 1>, scalar_prefetch = 0 : i64, scratch_operands = 1 : i64, tpu.core_type = #tpu.core_type<tc>, window_params = [{transform_indices = @transform_0, window_bounds = array<i64: 16, 32>}, {pipeline_mode = #tpu.pipeline_mode<synchronous>, transform_indices = @transform_1, window_bounds = array<i64: 32, 128>}, {pipeline_mode = #tpu.pipeline_mode<synchronous>, transform_indices = @transform_2, window_bounds = array<i64: 1, 128>}, {pipeline_mode = #tpu.pipeline_mode<synchronous>, transform_indices = @transform_3, window_bounds = array<i64: 128, 32>}, {pipeline_mode = #tpu.pipeline_mode<synchronous>, transform_indices = @transform_4, window_bounds = array<i64: 1, 32>}, {pipeline_mode = #tpu.pipeline_mode<synchronous>, transform_indices = @transform_5, window_bounds = array<i64: 1, 32>}, {pipeline_mode = #tpu.pipeline_mode<synchronous>, transform_indices = @transform_6, window_bounds = array<i64: 1, 32>}, {transform_indices = @transform_7, window_bounds = array<i64: 16, 32>}]} {
    %c0_i32 = arith.constant 0 : i32
    %0 = arith.cmpi eq, %arg1, %c0_i32 : i32
    %1 = arith.extui %0 : i1 to i32
    %c0_i32_0 = arith.constant 0 : i32
    %2 = arith.cmpi ne, %1, %c0_i32_0 : i32
    scf.if %2 {
      %cst_16 = arith.constant 0.000000e+00 : f32
      %21 = vector.broadcast %cst_16 : f32 to vector<16x32xf32>
      %c0_17 = arith.constant 0 : index
      %c0_18 = arith.constant 0 : index
      %22 = vector.load %arg10[%c0_17, %c0_18] : memref<16x32xf32, #tpu.memory_space<vmem>>, vector<16x32xf32>
      tpu.vector_store %arg10[%c0_17, %c0_18], %21 {strides = array<i32>} : memref<16x32xf32, #tpu.memory_space<vmem>>, vector<16x32xf32>,
    } else {
    }
    %c0 = arith.constant 0 : index
    %c0_1 = arith.constant 0 : index
    %3 = vector.load %arg2[%c0, %c0_1] : memref<16x32xf32, #tpu.memory_space<vmem>>, vector<16x32xf32>
    %4 = arith.truncf %3 : vector<16x32xf32> to vector<16x32xbf16>
    %c0_2 = arith.constant 0 : index
    %c0_3 = arith.constant 0 : index
    %5 = vector.load %arg3[%c0_2, %c0_3] : memref<32x128xbf16, #tpu.memory_space<vmem>>, vector<32x128xbf16>
    %cst = arith.constant dense<0.000000e+00> : vector<16x128xf32>
    %6 = tpu.matmul %4, %5, %cst {dimension_numbers = #tpu.dot_dimension_numbers<[1], [0], [0], [1], [0, 0, 1, 1], [], []>} : vector<16x32xbf16>, vector<32x128xbf16>, vector<16x128xf32> -> vector<16x128xf32>
    %c0_4 = arith.constant 0 : index
    %c0_5 = arith.constant 0 : index
    %7 = vector.load %arg4[%c0_4, %c0_5] : memref<1x128xf32, #tpu.memory_space<vmem>>, vector<1x128xf32>
    %8 = vector.broadcast %7 : vector<1x128xf32> to vector<16x128xf32>
    %9 = arith.addf %6, %8 : vector<16x128xf32>
    %cst_6 = arith.constant 0.000000e+00 : f32
    %10 = vector.broadcast %cst_6 : f32 to vector<16x128xf32>
    %11 = arith.maximumf %9, %10 : vector<16x128xf32>
    %12 = arith.truncf %11 : vector<16x128xf32> to vector<16x128xbf16>
    %c0_7 = arith.constant 0 : index
    %c0_8 = arith.constant 0 : index
    %13 = vector.load %arg10[%c0_7, %c0_8] : memref<16x32xf32, #tpu.memory_space<vmem>>, vector<16x32xf32>
    %c0_9 = arith.constant 0 : index
    %c0_10 = arith.constant 0 : index
    %14 = vector.load %arg5[%c0_9, %c0_10] : memref<128x32xbf16, #tpu.memory_space<vmem>>, vector<128x32xbf16>
    %cst_11 = arith.constant dense<0.000000e+00> : vector<16x32xf32>
    %15 = tpu.matmul %12, %14, %cst_11 {dimension_numbers = #tpu.dot_dimension_numbers<[1], [0], [0], [1], [0, 0, 1, 1], [], []>} : vector<16x128xbf16>, vector<128x32xbf16>, vector<16x32xf32> -> vector<16x32xf32>
    %16 = arith.addf %13, %15 : vector<16x32xf32>
    %c0_12 = arith.constant 0 : index
    %c0_13 = arith.constant 0 : index
    %17 = vector.load %arg10[%c0_12, %c0_13] : memref<16x32xf32, #tpu.memory_space<vmem>>, vector<16x32xf32>
    tpu.vector_store %arg10[%c0_12, %c0_13], %16 {strides = array<i32>} : memref<16x32xf32, #tpu.memory_space<vmem>>, vector<16x32xf32>,
    %c0_i32_14 = arith.constant 0 : i32
    %18 = arith.cmpi eq, %arg1, %c0_i32_14 : i32
    %19 = arith.extui %18 : i1 to i32
    %c0_i32_15 = arith.constant 0 : i32
    %20 = arith.cmpi ne, %19, %c0_i32_15 : i32
    scf.if %20 {
      %c0_16 = arith.constant 0 : index
      %c0_17 = arith.constant 0 : index
      %21 = vector.load %arg10[%c0_16, %c0_17] : memref<16x32xf32, #tpu.memory_space<vmem>>, vector<16x32xf32>
      %c0_18 = arith.constant 0 : index
      %c0_19 = arith.constant 0 : index
      %22 = vector.load %arg6[%c0_18, %c0_19] : memref<1x32xf32, #tpu.memory_space<vmem>>, vector<1x32xf32>
      %23 = vector.broadcast %22 : vector<1x32xf32> to vector<16x32xf32>
      %24 = arith.addf %21, %23 : vector<16x32xf32>
      %25 = arith.addf %24, %3 : vector<16x32xf32>
      %cst_20 = arith.constant dense<0.000000e+00> : vector<16xf32>
      %26 = vector.multi_reduction <add>, %25, %cst_20 [1] : vector<16x32xf32> to vector<16xf32>
      %27 = vector.shape_cast %26 : vector<16xf32> to vector<16x1xf32>
      %cst_21 = arith.constant 3.125000e-02 : f32
      %28 = vector.broadcast %cst_21 : f32 to vector<16x1xf32>
      %29 = arith.mulf %27, %28 : vector<16x1xf32>
      %30 = vector.broadcast %29 : vector<16x1xf32> to vector<16x32xf32>
      %31 = arith.subf %25, %30 : vector<16x32xf32>
      %32 = arith.mulf %31, %31 : vector<16x32xf32>
      %cst_22 = arith.constant dense<0.000000e+00> : vector<16xf32>
      %33 = vector.multi_reduction <add>, %32, %cst_22 [1] : vector<16x32xf32> to vector<16xf32>
      %34 = vector.shape_cast %33 : vector<16xf32> to vector<16x1xf32>
      %cst_23 = arith.constant 0.000000e+00 : f32
      %35 = vector.broadcast %cst_23 : f32 to vector<16x1xf32>
      %36 = arith.mulf %35, %29 : vector<16x1xf32>
      %37 = arith.mulf %36, %29 : vector<16x1xf32>
      %38 = arith.subf %34, %37 : vector<16x1xf32>
      %cst_24 = arith.constant 3.125000e-02 : f32
      %39 = vector.broadcast %cst_24 : f32 to vector<16x1xf32>
      %40 = arith.mulf %38, %39 : vector<16x1xf32>
      %cst_25 = arith.constant 9.99999974E-6 : f32
      %41 = vector.broadcast %cst_25 : f32 to vector<16x1xf32>
      %42 = arith.addf %40, %41 : vector<16x1xf32>
      %43 = math.rsqrt %42 : vector<16x1xf32>
      %44 = vector.broadcast %43 : vector<16x1xf32> to vector<16x32xf32>
      %45 = arith.mulf %31, %44 : vector<16x32xf32>
      %c0_26 = arith.constant 0 : index
      %c0_27 = arith.constant 0 : index
      %46 = vector.load %arg7[%c0_26, %c0_27] : memref<1x32xf32, #tpu.memory_space<vmem>>, vector<1x32xf32>
      %47 = vector.broadcast %46 : vector<1x32xf32> to vector<16x32xf32>
      %48 = arith.mulf %45, %47 : vector<16x32xf32>
      %c0_28 = arith.constant 0 : index
      %c0_29 = arith.constant 0 : index
      %49 = vector.load %arg8[%c0_28, %c0_29] : memref<1x32xf32, #tpu.memory_space<vmem>>, vector<1x32xf32>
      %50 = vector.broadcast %49 : vector<1x32xf32> to vector<16x32xf32>
      %51 = arith.addf %48, %50 : vector<16x32xf32>
      %c0_30 = arith.constant 0 : index
      %c0_31 = arith.constant 0 : index
      %52 = vector.load %arg9[%c0_30, %c0_31] : memref<16x32xf32, #tpu.memory_space<vmem>>, vector<16x32xf32>
      tpu.vector_store %arg9[%c0_30, %c0_31], %51 {strides = array<i32>} : memref<16x32xf32, #tpu.memory_space<vmem>>, vector<16x32xf32>,
    } else {
    }
    return
  }
  func.func @transform_0(%arg0: i32, %arg1: i32) -> (i32, i32) {
    %c0_i32 = arith.constant 0 : i32
    %c0_i32_0 = arith.constant 0 : i32
    return %arg0, %c0_i32 : i32, i32
  }
  func.func @transform_1(%arg0: i32, %arg1: i32) -> (i32, i32) {
    %c0_i32 = arith.constant 0 : i32
    %c0_i32_0 = arith.constant 0 : i32
    return %c0_i32, %arg1 : i32, i32
  }
  func.func @transform_2(%arg0: i32, %arg1: i32) -> (i32, i32) {
    %c0_i32 = arith.constant 0 : i32
    %c0_i32_0 = arith.constant 0 : i32
    return %c0_i32, %arg1 : i32, i32
  }
  func.func @transform_3(%arg0: i32, %arg1: i32) -> (i32, i32) {
    %c0_i32 = arith.constant 0 : i32
    %c0_i32_0 = arith.constant 0 : i32
    return %arg1, %c0_i32 : i32, i32
  }
  func.func @transform_4(%arg0: i32, %arg1: i32) -> (i32, i32) {
    %c0_i32 = arith.constant 0 : i32
    %c0_i32_0 = arith.constant 0 : i32
    %c0_i32_1 = arith.constant 0 : i32
    return %c0_i32, %c0_i32_0 : i32, i32
  }
  func.func @transform_5(%arg0: i32, %arg1: i32) -> (i32, i32) {
    %c0_i32 = arith.constant 0 : i32
    %c0_i32_0 = arith.constant 0 : i32
    %c0_i32_1 = arith.constant 0 : i32
    return %c0_i32, %c0_i32_0 : i32, i32
  }
  func.func @transform_6(%arg0: i32, %arg1: i32) -> (i32, i32) {
    %c0_i32 = arith.constant 0 : i32
    %c0_i32_0 = arith.constant 0 : i32
    %c0_i32_1 = arith.constant 0 : i32
    return %c0_i32, %c0_i32_0 : i32, i32
  }
  func.func @transform_7(%arg0: i32, %arg1: i32) -> (i32, i32) {
    %c0_i32 = arith.constant 0 : i32
    %c0_i32_0 = arith.constant 0 : i32
    return %arg0, %c0_i32 : i32, i32
  }
}

</mosaic_0001>

<bundles_post_ra>
// kernel: tpu_custom_call.1
= control target key start
LH: loop header
LB: loop body
LE: loop exit
PB: predicated region body
PF: predicated region fallthrough
CT: control target
= control target key end

     0   :  { %v400_v1 = vmov 0.0   ;;  %vm401_vm0 = vmmov 0   ;;  %vm32_vm1 = vcmask 261120   ;;  %s507_s0 = inlined_call_operand.vmem [shape: f32[16,32], index: 0, kind: input, shape index: {}]   ;;  %s508_s1 = inlined_call_operand.vmem [shape: bf16[32,128], index: 1, kind: input, shape index: {}]   ;;  %s509_s2 = inlined_call_operand.vmem [shape: f32[1,128], index: 2, kind: input, shape index: {}]   ;;  %s510_s3 = inlined_call_operand.vmem [shape: bf16[128,32], index: 3, kind: input, shape index: {}]   ;;  %s511_s4 = inlined_call_operand.vmem [shape: f32[1,32], index: 4, kind: input, shape index: {}]   ;;  %s512_s5 = inlined_call_operand.vmem [shape: f32[1,32], index: 5, kind: input, shape index: {}]   ;;  %s513_s6 = inlined_call_operand.vmem [shape: f32[1,32], index: 6, kind: input, shape index: {}]   ;;  %s514_s7 = inlined_call_operand.hbm [shape: f32[16,32], index: 7, kind: output, shape index: {}]  }
   0x1   :  { %v364_v0 = vld [vmem:[%s508_s1 + $0x8] sm:$0xff]   ;;  %331 = vmatprep.subr.bf16.mxu0 %v400_v1  ;;  %v365_v2 = vld [vmem:[%s508_s1] sm:$0xff]   ;;  %339 = vmatprep.subr.bf16.mxu1 %v400_v1  ;;  %33 = vst.msk [vmem:[#allocation2] sm:$0xff] %vm32_vm1, %v400_v1  ;;  %34 = vst.msk [vmem:[#allocation2 + $0x8] sm:$0xff] %vm32_vm1, %v400_v1 }
   0x2   :  { %332 = vmatpush3.bf16.msra.mxu0 %v364_v0  ;;  %335 = vmatprep.mubr.msk.bf16.mxu0 %vm401_vm0, %v400_v1  ;;  %v35_v3 = vld [vmem:[%s507_s0] sm:$0xff]  ;;  %v36_v4 = vld [vmem:[%s507_s0 + $0x8] sm:$0xff]  ;;  %v366_v5 = vld [vmem:[%s510_s3 + $0x38] sm:$0xff]  }
   0x3   :  { %333 = vmatprep.subr.bf16.mxu0 %v400_v1  ;;  %355 = vmatprep.mubr.msk.bf16.mxu1 %vm401_vm0, %v400_v1  ;;  %v37_v6 = vpack.c.bf16 %v36_v4, %v35_v3  ;;  %v367_v7 = vld [vmem:[%s510_s3 + $0x30] sm:$0xff]   ;;  %v368_v8 = vld [vmem:[%s510_s3 + $0x28] sm:$0xff]  }
   0x4   :  { %340 = vmatpush3.bf16.msra.mxu1 %v366_v5 }
   0x5   :  { %341 = vmatprep.subr.bf16.mxu1 %v400_v1 }
   0x6   :  { %334 = vmatpush3.bf16.msra.mxu0 %v365_v2 }
   0x8   :  { %342 = vmatpush3.bf16.msra.mxu1 %v367_v7 }
   0x9   :  { %336 = vmatmul.mubr.msk.bf16.vlgmr.msra.gmra.mxu0 %vm32_vm1, %v37_v6  ;;  %343 = vmatprep.subr.bf16.mxu1 %v400_v1 }
   0xa   :  { %12 = vsyncpa [#allocation4], 0  ;;  %v369_v9 = vld [vmem:[%s510_s3 + $0x20] sm:$0xff]   ;;  %v370_v10 = vld [vmem:[%s510_s3 + $0x18] sm:$0xff]   ;;  %s402_s28 = smov [#allocation3]  }
   0xb   :  { %v371_v11 = vld [vmem:[%s510_s3 + $0x10] sm:$0xff]   ;;  %v372_v12 = vld [vmem:[%s510_s3 + $0x8] sm:$0xff]   ;;  %v373_v13 = vld [vmem:[%s510_s3] sm:$0xff]   ;;  %s293_s29 = sshll.u32 %s402_s28, 4  ;;  %s294_s29 = int_to_ptr.vmem [resolvable:$true] %s293_s29 }
   0xc   :  { %344 = vmatpush3.bf16.msra.mxu1 %v368_v8  ;;  %v304_v14 = vld [vmem:[%s509_s2] ss:$0 sm:$0xff]  ;;  %v110_v28 = vld [vmem:[#allocation2 + $0x8] sm:$0xff]  ;;  %s378_s30 = scalar_lea.vmem %s294_s29, 256  ;;  %p383_p1 = scmp.lt.s32.totalorder %s294_s29, %s294_s29 }
   0xd   :  { %345 = vmatprep.subr.bf16.mxu1 %v400_v1  ;;  %v109_v24 = vld [vmem:[#allocation2] sm:$0xff]  ;;  %p379_p0 = scmp.ne.s32.totalorder %s294_s29, %s378_s30  ;;  %p384_p2 = scmp.lt.s32.totalorder %s378_s30, %s378_s30 }
   0xe   :  { %v316_v32 = vld [vmem:[%s511_s4] ss:$0 sm:$0xff] }
   0xf   :  { %v317_v0 = vld [vmem:[%s512_s5] ss:$0 sm:$0xff]  ;;  %p385_p3 = por %p384_p2, %p383_p1 }
  0x10   :  { %346 = vmatpush3.bf16.msra.mxu1 %v369_v9  ;;  %v318_v2 = vld [vmem:[%s513_s6] ss:$0 sm:$0xff] }
  0x11   :  { %347 = vmatprep.subr.bf16.mxu1 %v400_v1  ;;  %p386_p4 = pnand %p385_p3, %p379_p0 }
  0x14   :  { %348 = vmatpush3.bf16.msra.mxu1 %v370_v10 }
  0x15   :  { %349 = vmatprep.subr.bf16.mxu1 %v400_v1 }
  0x18   :  { %350 = vmatpush3.bf16.msra.mxu1 %v371_v11 }
  0x19   :  { %351 = vmatprep.subr.bf16.mxu1 %v400_v1 }
  0x1c   :  { %352 = vmatpush3.bf16.msra.mxu1 %v372_v12 }
  0x1d   :  { %353 = vmatprep.subr.bf16.mxu1 %v400_v1 }
  0x20   :  { %354 = vmatpush3.bf16.msra.mxu1 %v373_v13 }
  0xc9   :  { %v99_v15 = vpop.f32.mrf.mxu0 }
  0xca   :  { %v100_v17 = vadd.f32 %v304_v14, %v99_v15 }
  0xcb   :  { %v337_v16 = vpop.f32.mrf.mxu0 }
  0xcc   :  { %v106_v21 = vmax.f32 %v100_v17, 0.0 }
  0xcd   :  { %v102_v18 = vpop.f32.mrf.mxu0 }
  0xce   :  { %v103_v19 = vadd.f32 %v304_v14, %v102_v18 }
  0xcf   :  { %v338_v20 = vpop.f32.mrf.mxu0 }
  0xd0   :  { %v107_v22 = vmax.f32 %v103_v19, 0.0 }
  0xd2   :  { %v108_v23 = vpack.c.bf16 %v107_v22, %v106_v21 }
  0xd4   :  { %356 = vmatmul.mubr.bf16.vlgmr.msra.gmra.mxu1 %v108_v23 }
 0x194   :  { %v209_v25 = vpop.f32.mrf.mxu1 }
 0x195   :  { %v216_v26 = vadd.f32 %v209_v25, %v109_v24 }
 0x196   :  { %v357_v27 = vpop.f32.mrf.mxu1 }
 0x197   :  { %218 = vst.msk [vmem:[#allocation2] sm:$0xff] %vm32_vm1, %v216_v26 }
 0x198   :  { %v212_v29 = vpop.f32.mrf.mxu1 }
 0x199   :  { %v217_v30 = vadd.f32 %v212_v29, %v110_v28 }
 0x19a   :  { %v358_v31 = vpop.f32.mrf.mxu1 }
 0x19b   :  { %219 = vst.msk [vmem:[#allocation2 + $0x8] sm:$0xff] %vm32_vm1, %v217_v30 }
 0x19e   :  { %v223_v33 = vld [vmem:[#allocation2] sm:$0xff] }
 0x19f   :  { %v232_v34 = vadd.f32 %v316_v32, %v223_v33 }
 0x1a1   :  { %v234_v35 = vadd.f32 %v232_v34, %v35_v3 }
 0x1a2   :  { %v224_v36 = vld [vmem:[#allocation2 + $0x8] sm:$0xff] }
 0x1a3   :  { %v236_v37 = vsel %vm32_vm1, %v234_v35, 0.0  ;;  %v233_v38 = vadd.f32 %v316_v32, %v224_v36 }
 0x1a4   :  { %237 = vadd.xlane.f32.xlu0 %v236_v37 }
 0x1a5   :  { %v235_v39 = vadd.f32 %v233_v38, %v36_v4 }
 0x1a7   :  { %v239_v40 = vsel %vm32_vm1, %v235_v39, 0.0 }
 0x1a8   :  { %240 = vadd.xlane.f32.xlu0 %v239_v40 }
 0x22d   :  { %v238_v41 = vpop.xlane.xlu0 %237 }
 0x22e   :  { %v242_v42 = vmul.f32 0.03125, %v238_v41 }
 0x230   :  { %v244_v43 = vsub.f32 %v234_v35, %v242_v42  ;;  %v254_v51 = vmul.f32 0.0, %v242_v42 }
 0x231   :  { %v241_v44 = vpop.xlane.xlu0 %240 }
 0x232   :  { %v243_v45 = vmul.f32 0.03125, %v241_v44  ;;  %v246_v46 = vmul.f32 %v244_v43, %v244_v43  ;;  %v256_v53 = vmul.f32 %v254_v51, %v242_v42 }
 0x234   :  { %v245_v47 = vsub.f32 %v235_v39, %v243_v45  ;;  %v248_v48 = vsel %vm32_vm1, %v246_v46, 0.0  ;;  %v255_v52 = vmul.f32 0.0, %v243_v45 }
 0x235   :  { %249 = vadd.xlane.f32.xlu1 %v248_v48 }
 0x236   :  { %v247_v49 = vmul.f32 %v245_v47, %v245_v47  ;;  %v257_v57 = vmul.f32 %v255_v52, %v243_v45 }
 0x238   :  { %v251_v50 = vsel %vm32_vm1, %v247_v49, 0.0 }
 0x239   :  { %252 = vadd.xlane.f32.xlu1 %v251_v50 }
 0x2be   :  { %v250_v54 = vpop.xlane.xlu1 %249 }
 0x2bf   :  { %v258_v55 = vsub.f32 %v250_v54, %v256_v53 }
 0x2c1   :  { %v260_v56 = vmul.f32 0.03125, %v258_v55 }
 0x2c2   :  { %v253_v58 = vpop.xlane.xlu1 %252 }
 0x2c3   :  { %v262_v59 = vadd.f32 1e-05, %v260_v56  ;;  %v259_v60 = vsub.f32 %v253_v58, %v257_v57 }
 0x2c5   :  { %374 = vrsqrt.f32 %v262_v59  ;;  %v261_v61 = vmul.f32 0.03125, %v259_v60 }
 0x2c7   :  { %v263_v62 = vadd.f32 1e-05, %v261_v61 }
 0x2c9   :  { %376 = vrsqrt.f32 %v263_v62 }
 0x2d2   :  { %v375_v63 = vpop.eup %374 }
 0x2d3   :  { %v266_v1 = vmul.f32 %v375_v63, %v244_v43 }
 0x2d5   :  { %v275_v3 = vmul.f32 %v317_v0, %v266_v1 }
 0x2d6   :  { %v377_v4 = vpop.eup %376 }
 0x2d7   :  { %v267_v5 = vmul.f32 %v377_v4, %v245_v47  ;;  %v284_v6 = vadd.f32 %v318_v2, %v275_v3 }
 0x2d9   :  { %v276_v7 = vmul.f32 %v317_v0, %v267_v5  ;;  %286 = vst.msk [vmem:[#allocation3] sm:$0xff] %vm32_vm1, %v284_v6 }
 0x2db   :  { %v285_v8 = vadd.f32 %v318_v2, %v276_v7 }
 0x2dd   :  { %287 = vst.msk [vmem:[#allocation3 + $0x8] sm:$0xff] %vm32_vm1, %v285_v8 }
 0x2de   :  { %389 = shalt.err (!%p386_p4)
}
 0x2df   :  { %s403_s5 = smov 128   ;;  %s404_s6 = smov 8  }
 0x2e0   :  { %299 = dma.vmem_to_hbm [thread:$0]  %s294_s29, 256, %s514_s7, [#allocation4], %s403_s5, %s403_s5, %s404_s6  }
 0x2e1   :  { %398 = dma.done.wait [#allocation4], 256  }
 0x2e2   :  { %399 = vsyncadd [#allocation4], 4294967040 }
 0x2e3   :  { %303 = vsyncpa [#allocation4], 1 }

</bundles_post_ra>
